<compile_context>
chip_gen: v7x
topology: tpu7x:2x2x1
jax: 0.10.0
libtpu: 0.0.40
codegen_flags: <defaults>
</compile_context>

<pallas_src>
import functools

import jax
import jax.numpy as jnp
from jax.experimental import pallas as pl
from jax.experimental.pallas import tpu as pltpu

LANE = 128        # feature dims padded to a multiple of this (lane axis)
SUBLANE = 8       # batch tiles rounded to a multiple of this (sublane axis)
MAX_BLOCK_B = 512 # cap on the batch tile


def _round_up(x, m):
    return ((x + m - 1) // m) * m


def building_block_kernel(x_ref, w1_ref, b1_ref, w2_ref, b2_ref,
                          w3_ref, b3_ref, o_ref):
    """Fused 3x(Linear + ReLU) with the identity-shortcut x2 folded into fc3.

    x_ref: (block_b, d_in) f32; w*_ref: (Kp, Np) bf16; b*_ref: (1, Np) f32.
    All matmuls run on the MXU with bf16 inputs and f32 accumulation.
    """
    x = x_ref[...].astype(jnp.bfloat16)                 # cast hidden in-kernel

    h = jnp.dot(x, w1_ref[...],
                preferred_element_type=jnp.float32) + b1_ref[...]
    h = jnp.maximum(h, 0.0)                             # relu(fc1(x))

    h = jnp.dot(h.astype(jnp.bfloat16), w2_ref[...],
                preferred_element_type=jnp.float32) + b2_ref[...]
    h = jnp.maximum(h, 0.0)                             # relu(fc2(.))

    # w3/b3 are pre-scaled by 2, so this is 2*relu(fc3(.)) == h + shortcut(h);
    # the final relu is redundant (the value is already >= 0).
    h = jnp.dot(h.astype(jnp.bfloat16), w3_ref[...],
                preferred_element_type=jnp.float32) + b3_ref[...]
    h = jnp.maximum(h, 0.0)

    o_ref[...] = h.astype(o_ref.dtype)


def prepare_params(w1, b1, w2, b2, w3, b3):
    """One-time, off-hot-path parameter packing.

    PyTorch Linear weights are (out, in); transpose to (in, out) so the kernel
    computes y = x @ W_t + b.  Output (N) dims are zero-padded to 128-lane
    multiples so every MXU column / HBM store is lane-dense; K dims are padded
    only where they must match a padded upstream activation (w2, w3) -- w1's K
    stays at d_in so x needs no wrapper-side feature pad.  Weights are stored
    bf16 (halves weight DMA; MXU-native); biases stay f32 (added post-accum).
    The identity-shortcut x2 is folded into layer 3 (exact: x2 is a power of 2).
    """
    def pack_w(w, pad_k=True):
        w_t = jnp.asarray(w, jnp.float32).T              # (in, out)
        k, n = w_t.shape
        kp = _round_up(k, LANE) if pad_k else k
        npad = _round_up(n, LANE)
        return jnp.pad(w_t, ((0, kp - k), (0, npad - n))).astype(jnp.bfloat16)

    def pack_b(b):
        b = jnp.asarray(b, jnp.float32)
        (n,) = b.shape
        return jnp.pad(b, (0, _round_up(n, LANE) - n)).reshape(1, -1)

    return (pack_w(w1, pad_k=False), pack_b(b1),
            pack_w(w2), pack_b(b2),
            pack_w(2.0 * jnp.asarray(w3, jnp.float32)), pack_b(2.0 * jnp.asarray(b3, jnp.float32)))


@functools.partial(jax.jit, static_argnames=("dim_out", "block_b", "out_dtype"))
def building_block(x, w1_t, b1, w2_t, b2, w3_t, b3, *, dim_out,
                   block_b=None, out_dtype=jnp.float32):
    B, d_in = x.shape
    n1p = w1_t.shape[1]
    n2p = w2_t.shape[1]
    n3p = w3_t.shape[1]

    # Balanced batch tiles: >= 2 tiles whenever possible (v7x megacore), each a
    # multiple of 8 sublanes, capped at MAX_BLOCK_B, with <= block_b-1 padded
    # rows total instead of padding B up to a fixed multiple of 512.
    if block_b is None:
        if B >= 2 * SUBLANE:
            tiles = max(2, pl.cdiv(B, MAX_BLOCK_B))
            block_b = _round_up(pl.cdiv(B, tiles), SUBLANE)
        else:
            block_b = B          # single whole-array tile (allowed even if <8)
    b_pad = _round_up(B, block_b)

    # No wrapper cast; only pad the batch when it isn't already tile-aligned.
    xp = x if b_pad == B else jnp.pad(x, ((0, b_pad - B), (0, 0)))

    grid = (b_pad // block_b,)

    # Grid-invariant operands: resident in VMEM, single-buffered.
    def resident(a):
        return pl.BlockSpec(a.shape, lambda i: (0,) * a.ndim,
                            pipeline_mode=pl.Buffered(1))

    out_itemsize = jnp.dtype(out_dtype).itemsize
    x_itemsize = jnp.dtype(x.dtype).itemsize

    # VMEM budget: single-buffered bf16 weights + f32 biases, double-buffered
    # x/out tiles, plus live f32/bf16 intermediates, with headroom.
    weight_bytes = (w1_t.size + w2_t.size + w3_t.size) * 2
    bias_bytes = (b1.size + b2.size + b3.size) * 4
    needed = (weight_bytes + bias_bytes
              + 2 * block_b * d_in * x_itemsize
              + 2 * block_b * n3p * out_itemsize
              + 4 * block_b * max(n1p, n2p, n3p) * 4)
    vmem_limit = int(min(100 << 20, max(32 << 20, int(needed * 1.25) + (2 << 20))))

    flops = 2 * b_pad * (d_in * n1p + n1p * n2p + n2p * n3p)
    bytes_accessed = (b_pad * d_in * x_itemsize + weight_bytes + bias_bytes
                      + b_pad * n3p * out_itemsize)

    out_p = pl.pallas_call(
        building_block_kernel,
        out_shape=jax.ShapeDtypeStruct((b_pad, n3p), out_dtype),
        grid_spec=pltpu.PrefetchScalarGridSpec(
            num_scalar_prefetch=0,
            grid=grid,
            in_specs=[
                pl.BlockSpec((block_b, d_in), lambda i: (i, 0)),
                resident(w1_t), resident(b1),
                resident(w2_t), resident(b2),
                resident(w3_t), resident(b3),
            ],
            out_specs=pl.BlockSpec((block_b, n3p), lambda i: (i, 0)),
        ),
        compiler_params=pltpu.CompilerParams(
            dimension_semantics=("parallel",),
            vmem_limit_bytes=vmem_limit),
        cost_estimate=pl.CostEstimate(
            flops=flops, transcendentals=0, bytes_accessed=bytes_accessed),
    )(xp, w1_t, b1, w2_t, b2, w3_t, b3)

    return out_p[:B, :dim_out]


def kaiming_normal(key, out_dim, in_dim):
    # torch.nn.init.kaiming_normal_(w, nonlinearity='relu'), fan_in mode:
    # std = sqrt(2 / fan_in), fan_in = in_dim for a Linear weight (out, in).
    std = (2.0 / in_dim) ** 0.5
    return std * jax.random.normal(key, (out_dim, in_dim), dtype=jnp.float32)


def reference_f32(x, w1, b1, w2, b2, w3, b3):
    h = jax.nn.relu(x @ w1.T + b1)
    h = jax.nn.relu(h @ w2.T + b2)
    h = jax.nn.relu(h @ w3.T + b3)
    return jax.nn.relu(h + h)


def reference_matched(x, w1, b1, w2, b2, w3, b3):
    # Same numerics as the kernel: bf16 matmul operands, f32 accumulation.
    bf = jnp.bfloat16

    def lin(a, w, b):
        return jnp.dot(a.astype(bf), w.T.astype(bf),
                       preferred_element_type=jnp.float32) + b

    h = jax.nn.relu(lin(x, w1, b1))
    h = jax.nn.relu(lin(h, w2, b2))
    h = jax.nn.relu(lin(h, w3, b3))
    return jax.nn.relu(h + h)


if __name__ == "__main__":
    key = jax.random.PRNGKey(0)
    k_x, k_x2, k1, k2, k3 = jax.random.split(key, 5)

    batch, dim_in, dim_out = 16, 32, 64

    x = jax.random.normal(k_x, (batch, dim_in), dtype=jnp.float32)

    w1 = kaiming_normal(k1, dim_in, dim_in)     # fc1: (dim_in, dim_in)
    w2 = kaiming_normal(k2, dim_out, dim_in)    # fc2: (dim_out, dim_in)
    w3 = kaiming_normal(k3, dim_out, dim_out)   # fc3: (dim_out, dim_out)
    b1 = jnp.zeros((dim_in,), dtype=jnp.float32)
    b2 = jnp.zeros((dim_out,), dtype=jnp.float32)
    b3 = jnp.zeros((dim_out,), dtype=jnp.float32)

    params = prepare_params(w1, b1, w2, b2, w3, b3)

    # Main case: B=16 -> two parallel 8-row tiles.
    out = building_block(x, *params, dim_out=dim_out)
    out = jax.block_until_ready(out)
    assert out.shape == (batch, dim_out)

    ref_m = reference_matched(x, w1, b1, w2, b2, w3, b3)
    assert jnp.allclose(out, ref_m, atol=1e-2, rtol=1e-2), "mismatch vs matched ref"

    ref_f = reference_f32(x, w1, b1, w2, b2, w3, b3)
    assert jnp.allclose(out, ref_f, atol=2e-1, rtol=1e-1), "mismatch vs f32 ref"

    # Ragged small batch (single whole-array tile, no padding) sanity check.
    x_small = jax.random.normal(k_x2, (13, dim_in), dtype=jnp.float32)
    out_small = jax.block_until_ready(
        building_block(x_small, *params, dim_out=dim_out))
    ref_small = reference_matched(x_small, w1, b1, w2, b2, w3, b3)
    assert out_small.shape == (13, dim_out)
    assert jnp.allclose(out_small, ref_small, atol=1e-2, rtol=1e-2), \
        "mismatch vs matched ref (ragged batch)"

    print("KERNEL_OK")
</pallas_src>

<mosaic_0001>
module attributes {stable_mosaic.version = 11 : i64} {
  func.func @building_block_kernel(%arg0: i32, %arg1: memref<8x32xf32, #tpu.memory_space<vmem>>, %arg2: memref<32x128xbf16, #tpu.memory_space<vmem>>, %arg3: memref<1x128xf32, #tpu.memory_space<vmem>>, %arg4: memref<128x128xbf16, #tpu.memory_space<vmem>>, %arg5: memref<1x128xf32, #tpu.memory_space<vmem>>, %arg6: memref<128x128xbf16, #tpu.memory_space<vmem>>, %arg7: memref<1x128xf32, #tpu.memory_space<vmem>>, %arg8: memref<8x128xf32, #tpu.memory_space<vmem>>) attributes {dimension_semantics = [#tpu.dimension_semantics<parallel>], iteration_bounds = array<i64: 2>, scalar_prefetch = 0 : i64, scratch_operands = 0 : i64, tpu.core_type = #tpu.core_type<tc>, window_params = [{transform_indices = @transform_0, window_bounds = array<i64: 8, 32>}, {pipeline_mode = #tpu.pipeline_mode<synchronous>, transform_indices = @transform_1, window_bounds = array<i64: 32, 128>}, {pipeline_mode = #tpu.pipeline_mode<synchronous>, transform_indices = @transform_2, window_bounds = array<i64: 1, 128>}, {pipeline_mode = #tpu.pipeline_mode<synchronous>, transform_indices = @transform_3, window_bounds = array<i64: 128, 128>}, {pipeline_mode = #tpu.pipeline_mode<synchronous>, transform_indices = @transform_4, window_bounds = array<i64: 1, 128>}, {pipeline_mode = #tpu.pipeline_mode<synchronous>, transform_indices = @transform_5, window_bounds = array<i64: 128, 128>}, {pipeline_mode = #tpu.pipeline_mode<synchronous>, transform_indices = @transform_6, window_bounds = array<i64: 1, 128>}, {transform_indices = @transform_7, window_bounds = array<i64: 8, 128>}]} {
    %c0 = arith.constant 0 : index
    %c0_0 = arith.constant 0 : index
    %0 = vector.load %arg1[%c0, %c0_0] : memref<8x32xf32, #tpu.memory_space<vmem>>, vector<8x32xf32>
    %1 = arith.truncf %0 : vector<8x32xf32> to vector<8x32xbf16>
    %c0_1 = arith.constant 0 : index
    %c0_2 = arith.constant 0 : index
    %2 = vector.load %arg2[%c0_1, %c0_2] : memref<32x128xbf16, #tpu.memory_space<vmem>>, vector<32x128xbf16>
    %cst = arith.constant dense<0.000000e+00> : vector<8x128xf32>
    %3 = tpu.matmul %1, %2, %cst {dimension_numbers = #tpu.dot_dimension_numbers<[1], [0], [0], [1], [0, 0, 1, 1], [], []>} : vector<8x32xbf16>, vector<32x128xbf16>, vector<8x128xf32> -> vector<8x128xf32>
    %c0_3 = arith.constant 0 : index
    %c0_4 = arith.constant 0 : index
    %4 = vector.load %arg3[%c0_3, %c0_4] : memref<1x128xf32, #tpu.memory_space<vmem>>, vector<1x128xf32>
    %5 = vector.broadcast %4 : vector<1x128xf32> to vector<8x128xf32>
    %6 = arith.addf %3, %5 : vector<8x128xf32>
    %cst_5 = arith.constant 0.000000e+00 : f32
    %7 = vector.broadcast %cst_5 : f32 to vector<8x128xf32>
    %8 = arith.maximumf %6, %7 : vector<8x128xf32>
    %9 = arith.truncf %8 : vector<8x128xf32> to vector<8x128xbf16>
    %c0_6 = arith.constant 0 : index
    %c0_7 = arith.constant 0 : index
    %10 = vector.load %arg4[%c0_6, %c0_7] : memref<128x128xbf16, #tpu.memory_space<vmem>>, vector<128x128xbf16>
    %cst_8 = arith.constant dense<0.000000e+00> : vector<8x128xf32>
    %11 = tpu.matmul %9, %10, %cst_8 {dimension_numbers = #tpu.dot_dimension_numbers<[1], [0], [0], [1], [0, 0, 1, 1], [], []>} : vector<8x128xbf16>, vector<128x128xbf16>, vector<8x128xf32> -> vector<8x128xf32>
    %c0_9 = arith.constant 0 : index
    %c0_10 = arith.constant 0 : index
    %12 = vector.load %arg5[%c0_9, %c0_10] : memref<1x128xf32, #tpu.memory_space<vmem>>, vector<1x128xf32>
    %13 = vector.broadcast %12 : vector<1x128xf32> to vector<8x128xf32>
    %14 = arith.addf %11, %13 : vector<8x128xf32>
    %cst_11 = arith.constant 0.000000e+00 : f32
    %15 = vector.broadcast %cst_11 : f32 to vector<8x128xf32>
    %16 = arith.maximumf %14, %15 : vector<8x128xf32>
    %17 = arith.truncf %16 : vector<8x128xf32> to vector<8x128xbf16>
    %c0_12 = arith.constant 0 : index
    %c0_13 = arith.constant 0 : index
    %18 = vector.load %arg6[%c0_12, %c0_13] : memref<128x128xbf16, #tpu.memory_space<vmem>>, vector<128x128xbf16>
    %cst_14 = arith.constant dense<0.000000e+00> : vector<8x128xf32>
    %19 = tpu.matmul %17, %18, %cst_14 {dimension_numbers = #tpu.dot_dimension_numbers<[1], [0], [0], [1], [0, 0, 1, 1], [], []>} : vector<8x128xbf16>, vector<128x128xbf16>, vector<8x128xf32> -> vector<8x128xf32>
    %c0_15 = arith.constant 0 : index
    %c0_16 = arith.constant 0 : index
    %20 = vector.load %arg7[%c0_15, %c0_16] : memref<1x128xf32, #tpu.memory_space<vmem>>, vector<1x128xf32>
    %21 = vector.broadcast %20 : vector<1x128xf32> to vector<8x128xf32>
    %22 = arith.addf %19, %21 : vector<8x128xf32>
    %cst_17 = arith.constant 0.000000e+00 : f32
    %23 = vector.broadcast %cst_17 : f32 to vector<8x128xf32>
    %24 = arith.maximumf %22, %23 : vector<8x128xf32>
    %c0_18 = arith.constant 0 : index
    %c0_19 = arith.constant 0 : index
    %25 = vector.load %arg8[%c0_18, %c0_19] : memref<8x128xf32, #tpu.memory_space<vmem>>, vector<8x128xf32>
    tpu.vector_store %arg8[%c0_18, %c0_19], %24 {strides = array<i32>} : memref<8x128xf32, #tpu.memory_space<vmem>>, vector<8x128xf32>,
    return
  }
  func.func @transform_0(%arg0: i32) -> (i32, i32) {
    %c0_i32 = arith.constant 0 : i32
    %c0_i32_0 = arith.constant 0 : i32
    return %arg0, %c0_i32 : i32, i32
  }
  func.func @transform_1(%arg0: i32) -> (i32, i32) {
    %c0_i32 = arith.constant 0 : i32
    %c0_i32_0 = arith.constant 0 : i32
    %c0_i32_1 = arith.constant 0 : i32
    return %c0_i32, %c0_i32_0 : i32, i32
  }
  func.func @transform_2(%arg0: i32) -> (i32, i32) {
    %c0_i32 = arith.constant 0 : i32
    %c0_i32_0 = arith.constant 0 : i32
    %c0_i32_1 = arith.constant 0 : i32
    return %c0_i32, %c0_i32_0 : i32, i32
  }
  func.func @transform_3(%arg0: i32) -> (i32, i32) {
    %c0_i32 = arith.constant 0 : i32
    %c0_i32_0 = arith.constant 0 : i32
    %c0_i32_1 = arith.constant 0 : i32
    return %c0_i32, %c0_i32_0 : i32, i32
  }
  func.func @transform_4(%arg0: i32) -> (i32, i32) {
    %c0_i32 = arith.constant 0 : i32
    %c0_i32_0 = arith.constant 0 : i32
    %c0_i32_1 = arith.constant 0 : i32
    return %c0_i32, %c0_i32_0 : i32, i32
  }
  func.func @transform_5(%arg0: i32) -> (i32, i32) {
    %c0_i32 = arith.constant 0 : i32
    %c0_i32_0 = arith.constant 0 : i32
    %c0_i32_1 = arith.constant 0 : i32
    return %c0_i32, %c0_i32_0 : i32, i32
  }
  func.func @transform_6(%arg0: i32) -> (i32, i32) {
    %c0_i32 = arith.constant 0 : i32
    %c0_i32_0 = arith.constant 0 : i32
    %c0_i32_1 = arith.constant 0 : i32
    return %c0_i32, %c0_i32_0 : i32, i32
  }
  func.func @transform_7(%arg0: i32) -> (i32, i32) {
    %c0_i32 = arith.constant 0 : i32
    %c0_i32_0 = arith.constant 0 : i32
    return %arg0, %c0_i32 : i32, i32
  }
}

</mosaic_0001>

<bundles_post_ra>
// kernel: building_block.1
= control target key start
LH: loop header
LB: loop body
LE: loop exit
PB: predicated region body
PF: predicated region fallthrough
CT: control target
= control target key end

     0   :  { %12 = vsyncpa [#allocation3], 0  ;;  %s1496_s0 = inlined_call_operand.hbm [shape: f32[16,32], index: 0, kind: input, shape index: {}]   ;;  %s1497_s1 = inlined_call_operand.hbm [shape: bf16[32,128], index: 1, kind: input, shape index: {}]   ;;  %s1498_s2 = inlined_call_operand.vmem [shape: f32[1,128], index: 2, kind: input, shape index: {}]   ;;  %s1499_s3 = inlined_call_operand.hbm [shape: bf16[128,128], index: 3, kind: input, shape index: {}]   ;;  %s1500_s4 = inlined_call_operand.vmem [shape: f32[1,128], index: 4, kind: input, shape index: {}]   ;;  %s1501_s5 = inlined_call_operand.hbm [shape: bf16[128,128], index: 5, kind: input, shape index: {}]   ;;  %s1502_s6 = inlined_call_operand.vmem [shape: f32[1,128], index: 6, kind: input, shape index: {}]   ;;  %s1503_s7 = inlined_call_operand.hbm [shape: f32[16,128], index: 7, kind: output, shape index: {}]  }
   0x1   :  { %14 = vsyncpa [#allocation3 + $0x1], 0 }
   0x2   :  { %15 = vsyncpa [#allocation6], 0 }
   0x3   :  { %16 = vsyncpa [#allocation9], 0 }
   0x4   :  { %17 = vsyncpa [#allocation4], 0 }
   0x5   :  { %19 = vsyncpa [#allocation4 + $0x1], 0  ;;  %s1196_s24 = smov 0   ;;  %s1198_s25 = smov 0  }
   0x6   :  { %s1200_s26 = smov 0   ;;  %s1202_s27 = smov 0  }
   0x7 LB: > { %s1217_s28 = sadd.s32 4294967295, %s1145_s27   ;;  %s749_s29 = sadd.s32 4294967294, %s1145_s27   ;;  %s1145_s27 = sphi %s1202_s27, %s1529_s27   ;;  %s1141_s26 = sphi %s1200_s26, %s1528_s26   ;;  %s1137_s25 = sphi %s1198_s25, %s1527_s25   ;;  %s1133_s24 = sphi %s1196_s24, %s1526_s24  }
   0x8   : > { %p45_p0 = scmp.ne.s32.totalorder %s1137_s25, %s1133_s24  ;;  %p1504_p1 = scmp.eq.s32.totalorder %s1217_s28, 0 }
   0x9   : > { %p201_p3 = scmp.eq.s32.totalorder %s749_s29, 1  ;;  %p750_p5 = scmp.ge.s32.totalorder %s1145_s27, 1 }
   0xa   : > { %p1226_p4 = por %p1504_p1, %p45_p0  ;;  %p208_p7 = scmp.lt.s32.totalorder %s1145_s27, 3 }
   0xb   : > { %p1231_p6 = por %p201_p3, %p45_p0  ;;  %s1147_s10 = smov [#allocation5]  }
   0xc   : > { %s1508_s30 = scalar_select %p1226_p4, 1, 0 }
   0xd   : > { %s1509_s8 = scalar_select %p1231_p6, 1, 0 }
   0xe   : > { %p1236_p8 = pnand %p750_p5, %p208_p7  ;;  %s220_s11 = sshll.u32 %s1147_s10, 4  ;;  %s1240_s11 = int_to_ptr.vmem [resolvable:$true] %s220_s11 }
   0xf   : > { %1510 = sst [smem:[#allocation15_spill]] %s1509_s8  ;;  %s1148_s13 = smov [#allocation7]  }
  0x10   : > { %s1511_s9 = scalar_select %p1236_p8, 1, 0 }
  0x11   : > { %p874_p9 = pneg %p1236_p8  ;;  %s236_s14 = sshll.u32 %s1148_s13, 4  ;;  %s1251_s14 = int_to_ptr.vmem [resolvable:$true] %s236_s14 }
  0x12   : > { %s1149_s15 = smov [#allocation8]   ;;  %s957_s19 = scalar_lea.hbm %s1497_s1, 256 }
  0x13   : > { %p1247_p11 = pnand %p874_p9, %p1504_p1  ;;  %s1253_s16 = sshll.u32 %s1149_s15, 4  ;;  %s253_s16 = int_to_ptr.vmem [resolvable:$true] %s1253_s16 }
  0x14   : > { %p958_p12 = scmp.ne.s32.totalorder %s1497_s1, %s957_s19  ;;  %p964_p5 = scmp.lt.u32.totalorder %s957_s19, %s1497_s1 }
  0x15   : > { %p1263_p13 = pneg %p1247_p11 }
  0x17   : > { %p960_p0 = pnand %p1263_p13, %p958_p12 }
  0x19   : > { %p961_p3 = pneg %p960_p0 }
  0x1b   : > { %p966_p7 = pnand %p964_p5, %p961_p3 }
  0x1d   : > { %969 = shalt.err (!%p966_p7)
}
  0x1e   : > { %s970_s10 = scalar_lea.vmem %s1240_s11, 256  ;;  %p978_p2 = scmp.lt.s32.totalorder %s1240_s11, %s1240_s11 }
  0x1f   : > { %p971_p9 = scmp.ne.s32.totalorder %s1240_s11, %s970_s10  ;;  %p979_p6 = scmp.lt.s32.totalorder %s970_s10, %s970_s10 }
  0x21   : > { %p973_p10 = pnand %p971_p9, %p1263_p13  ;;  %p980_p12 = por %p979_p6, %p978_p2 }
  0x23   : > { %p974_p1 = pneg %p973_p10 }
  0x25   : > { %p981_p0 = pnand %p980_p12, %p974_p1 }
  0x27   : > { %984 = shalt.err (!%p981_p0)
}
  0x28   : > { %s1150_s13 = smov 64   ;;  %s1151_s15 = smov 4  }
  0x29   : > { %877 = dma.hbm_to_vmem [thread:$0]  (!%p1247_p11), %s1497_s1, 256, %s1240_s11, [#allocation6], %s1150_s13, %s1150_s13, %s1151_s15  }
  0x2a   : > { %s985_s21 = scalar_lea.hbm %s1499_s3, 1024 }
  0x2b   : > { %p986_p1 = scmp.ne.s32.totalorder %s1499_s3, %s985_s21  ;;  %p992_p10 = scmp.lt.u32.totalorder %s985_s21, %s1499_s3 }
  0x2d   : > { %p988_p2 = pnand %p986_p1, %p1263_p13 }
  0x2f   : > { %p989_p6 = pneg %p988_p2 }
  0x31   : > { %p994_p3 = pnand %p992_p10, %p989_p6 }
  0x33   : > { %997 = shalt.err (!%p994_p3)
}
  0x34   : > { %s998_s11 = scalar_lea.vmem %s1251_s14, 1024  ;;  %p1006_p12 = scmp.lt.s32.totalorder %s1251_s14, %s1251_s14 }
  0x35   : > { %p999_p5 = scmp.ne.s32.totalorder %s1251_s14, %s998_s11  ;;  %p1007_p0 = scmp.lt.s32.totalorder %s998_s11, %s998_s11 }
  0x37   : > { %p1001_p7 = pnand %p999_p5, %p1263_p13  ;;  %p1008_p1 = por %p1007_p0, %p1006_p12 }
  0x39   : > { %p1002_p9 = pneg %p1001_p7 }
  0x3b   : > { %p1009_p2 = pnand %p1008_p1, %p1002_p9 }
  0x3d   : > { %1012 = shalt.err (!%p1009_p2)
}
  0x3e   : > { %880 = dma.hbm_to_vmem [thread:$0]  (!%p1247_p11), %s1499_s3, 1024, %s1251_s14, [#allocation6], %s1150_s13, %s1150_s13, %s1151_s15  }
  0x3f   : > { %s1013_s20 = scalar_lea.hbm %s1501_s5, 1024 }
  0x40   : > { %p1014_p6 = scmp.ne.s32.totalorder %s1501_s5, %s1013_s20  ;;  %p1020_p5 = scmp.lt.u32.totalorder %s1013_s20, %s1501_s5 }
  0x42   : > { %p1016_p10 = pnand %p1014_p6, %p1263_p13 }
  0x44   : > { %p1017_p3 = pneg %p1016_p10 }
  0x46   : > { %p1022_p7 = pnand %p1020_p5, %p1017_p3 }
  0x48   : > { %1025 = shalt.err (!%p1022_p7)
}
  0x49   : > { %s1026_s11 = scalar_lea.vmem %s253_s16, 1024  ;;  %p1034_p1 = scmp.lt.s32.totalorder %s253_s16, %s253_s16 }
  0x4a   : > { %p1027_p9 = scmp.ne.s32.totalorder %s253_s16, %s1026_s11  ;;  %p1035_p2 = scmp.lt.s32.totalorder %s1026_s11, %s1026_s11 }
  0x4c   : > { %p1029_p12 = pnand %p1027_p9, %p1263_p13  ;;  %p1036_p4 = por %p1035_p2, %p1034_p1 }
  0x4e   : > { %p1030_p0 = pneg %p1029_p12 }
  0x50   : > { %p1037_p8 = pnand %p1036_p4, %p1030_p0 }
  0x52   : > { %1040 = shalt.err (!%p1037_p8)
}
  0x53   : > { %883 = dma.hbm_to_vmem [thread:$0]  (!%p1247_p11), %s1501_s5, 1024, %s253_s16, [#allocation9], %s1150_s13, %s1150_s13, %s1151_s15  }
  0x54   : > { %s1336_s22 = sadd.s32 1, %s1145_s27   ;;  %s32_s17 = sadd.s32 1, %s1141_s26 }
  0x55   : > { %s29_s12 = ssub.s32 %s1145_s27, %s1336_s22  ;;  %p39_p8 = scmp.ne.s32.totalorder %s1141_s26, %s1137_s25 }
  0x56   : > { %p30_p4 = scmp.eq.s32.totalorder %s29_s12, 0  ;;  %p40_p13 = scmp.eq.s32.totalorder %s1145_s27, 0 }
  0x57   : > { %p895_p6 = scmp.lt.s32.totalorder %s1145_s27, 2  ;;  %p1514_p3 = scmp.eq.s32.totalorder %s1217_s28, 1 }
  0x58   : > { %s1346_s18 = scalar_select %p30_p4, %s1141_s26, %s32_s17  }
  0x59   : > { %p41_p10 = por %p40_p13, %p39_p8  ;;  %p1350_p5 = por %p1514_p3, %p39_p8 }
  0x5a   : > { %s269_s20 = sand.u32 1, %s1141_s26   ;;  %s756_s21 = sshll.u32 %s1145_s27, 7 }
  0x5b   : > { %s755_s16 = sshll.u32 %s269_s20, 3  ;;  %s1359_s23 = scalar_lea.hbm %s1496_s0, %s756_s21 }
  0x5c   : > { %s273_s29 = scalar_lea.vmem [#allocation2], %s755_s16  ;;  %p1361_p11 = pnand %p895_p6, %p41_p10 }
  0x5d   : > { %s280_s10 = sshll.u32 %s273_s29, 4  ;;  %s270_s14 = scalar_lea.sflag [#allocation3], %s269_s20  ;;  %s1365_s10 = int_to_ptr.vmem [resolvable:$true] %s280_s10 }
  0x5e   : > { %s1041_s8 = scalar_lea.hbm %s1359_s23, 128  ;;  %p1043_p9 = pneg %p1361_p11 }
  0x5f   : > { %p1042_p7 = scmp.ne.s32.totalorder %s1359_s23, %s1041_s8  ;;  %s1046_s21 = scalar_lea.hbm %s1496_s0, 256 }
  0x60   : > { %p1047_p1 = scmp.lt.u32.totalorder %s1359_s23, %s1496_s0  ;;  %p1048_p2 = scmp.lt.u32.totalorder %s1046_s21, %s1041_s8 }
  0x61   : > { %p1044_p12 = pnand %p1043_p9, %p1042_p7  ;;  %p1050_p8 = scmp.lt.u32.totalorder %s1041_s8, %s1359_s23 }
  0x62   : > { %p1049_p4 = por %p1048_p2, %p1047_p1 }
  0x63   : > { %p1045_p0 = pneg %p1044_p12 }
  0x64   : > { %p1051_p13 = por %p1050_p8, %p1049_p4 }
  0x66   : > { %p1052_p6 = pnand %p1051_p13, %p1045_p0 }
  0x68   : > { %1055 = shalt.err (!%p1052_p6)
}
  0x69   : > { %s1056_s20 = scalar_lea.vmem %s1365_s10, 128  ;;  %s1152_s15 = smov [#allocation2]  }
  0x6a   : > { %p1057_p10 = scmp.ne.s32.totalorder %s1365_s10, %s1056_s20  ;;  %s1061_s29 = sshll.u32 %s1152_s15, 4  ;;  %s1062_s29 = int_to_ptr.vmem [resolvable:$false] %s1061_s29 }
  0x6b   : > { %s1063_s12 = scalar_lea.vmem %s1062_s29, 256  ;;  %p1064_p12 = scmp.lt.s32.totalorder %s1365_s10, %s1062_s29 }
  0x6c   : > { %p1059_p3 = pnand %p1057_p10, %p1043_p9  ;;  %p1065_p1 = scmp.lt.s32.totalorder %s1063_s12, %s1056_s20 }
  0x6e   : > { %p1060_p7 = pneg %p1059_p3  ;;  %p1066_p2 = por %p1065_p1, %p1064_p12 }
  0x70   : > { %p1067_p4 = pnand %p1066_p2, %p1060_p7 }
  0x72   : > { %1070 = shalt.err (!%p1067_p4)
}
  0x73   : > { %887 = dma.hbm_to_vmem [thread:$0]  (!%p1361_p11), %s1359_s23, 128, %s1365_s10, %s270_s14  }
  0x74   : > { %p1517_p0 = scmp.ne.s32.totalorder %s1511_s9, 0 }
  0x75   : > { %s1395_s8 = sand.u32 (!%p1517_p0), 1, %s1137_s25   ;;  %p1518_p9 = scmp.ne.s32.totalorder (!%p1517_p0), %s1508_s30, 0 }
  0x76   : > { %289 = sbr.rel (%p1517_p0) target bundleno = 809 (0x329), region = 48  ;;  %s758_s17 = sshll.u32 (!%p1517_p0), %s1395_s8, 3 }
  0x77   : > { %s292_s21 = scalar_lea.sflag (!%p1517_p0), [#allocation3], %s1395_s8  ;;  %s295_s16 = scalar_lea.vmem (!%p1517_p0), [#allocation2], %s758_s17 }
  0x7d   : > { %1116 = dma.done.wait (%p1518_p9), %s292_s21, 128  }
  0x7e   : > { %1118 = vsyncadd (%p1518_p9), %s292_s21, 4294967168  ;;  %p1519_p11 = scmp.eq.s32.totalorder %s1217_s28, 0 }
  0x80   : > { %1120 = dma.done.wait (%p1519_p11), [#allocation6], 1280   ;;  %p1520_p8 = pmov %p1519_p11 }
  0x82   : > { %1122 = vsyncadd (%p1520_p8), [#allocation6], 4294966016  ;;  %p1521_p13 = pmov %p1520_p8 }
  0x83   : > { %p1522_p6 = pmov %p1520_p8 }
  0x84   : > { %1124 = dma.done.wait (%p1521_p13), [#allocation9], 1024  }
  0x85   : > { %1126 = vsyncadd (%p1522_p6), [#allocation9], 4294966272  ;;  %v1153_v0 = vmov 0.0   ;;  %vm1154_vm0 = vmmov 0   ;;  %v939_v1 = vld [vmem:[#allocation5] sm:$0xff]   ;;  %v940_v2 = vld [vmem:[#allocation5 + $0x8] sm:$0xff]  }
  0x86   : > { %810 = vmatprep.subr.bf16.mxu0 %v1153_v0  ;;  %814 = vmatprep.mubr.msk.bf16.mxu0 %vm1154_vm0, %v1153_v0  ;;  %v339_v3 = vld [vmem:[%s295_s16] sm:$0xff]  ;;  %vm364_vm1 = vcmask 261120   ;;  %v943_v7 = vld [vmem:[#allocation7 + $0x10] sm:$0xff]   ;;  %v944_v8 = vld [vmem:[#allocation7 + $0x18] sm:$0xff]   ;;  %s786_s13 = sshll.u32 %s1217_s28, 7  ;;  %s337_s20 = scalar_lea.vmem [#allocation10], %s758_s17 }
  0x87   : > { %818 = vmatprep.subr.bf16.mxu1 %v1153_v0  ;;  %834 = vmatprep.mubr.msk.bf16.mxu1 %vm1154_vm0, %v1153_v0  ;;  %v941_v4 = vld [vmem:[#allocation7] sm:$0xff]   ;;  %v340_v5 = vpack.c.bf16 %v339_v3, %v339_v3  ;;  %v942_v6 = vld [vmem:[#allocation7 + $0x8] sm:$0xff]   ;;  %v947_v11 = vld [vmem:[#allocation7 + $0x30] sm:$0xff]   ;;  %s650_s15 = sshll.u32 %s337_s20, 4  ;;  %s1452_s21 = scalar_lea.hbm %s1503_s7, %s786_s13  ;;  %s1454_s15 = int_to_ptr.vmem [resolvable:$true] %s650_s15 }
  0x88   : > { %811 = vmatpush3.bf16.msra.mxu0 %v939_v1  ;;  %819 = vmatpush3.bf16.msra.mxu1 %v941_v4  ;;  %v945_v9 = vld [vmem:[#allocation7 + $0x20] sm:$0xff]   ;;  %v946_v10 = vld [vmem:[#allocation7 + $0x28] sm:$0xff]   ;;  %v948_v12 = vld [vmem:[#allocation7 + $0x38] sm:$0xff]   ;;  %s637_s28 = scalar_lea.sflag [#allocation4], %s1395_s8  ;;  %s1071_s16 = scalar_lea.vmem %s1454_s15, 128 }
  0x89   : > { %812 = vmatprep.subr.bf16.mxu0 %v1153_v0  ;;  %820 = vmatprep.subr.bf16.mxu1 %v1153_v0  ;;  %v949_v13 = vld [vmem:[#allocation8] sm:$0xff]   ;;  %v950_v14 = vld [vmem:[#allocation8 + $0x8] sm:$0xff]   ;;  %v951_v15 = vld [vmem:[#allocation8 + $0x10] sm:$0xff]   ;;  %p1072_p10 = scmp.ne.s32.totalorder %s1454_s15, %s1071_s16  ;;  %s1155_s17 = smov [#allocation10]  }
  0x8a   : > { %v952_v16 = vld [vmem:[#allocation8 + $0x18] sm:$0xff]   ;;  %v953_v17 = vld [vmem:[#allocation8 + $0x20] sm:$0xff]   ;;  %v954_v18 = vld [vmem:[#allocation8 + $0x28] sm:$0xff]   ;;  %s1075_s30 = sshll.u32 %s1155_s17, 4  ;;  %s1076_s30 = int_to_ptr.vmem [resolvable:$false] %s1075_s30 }
  0x8b   : > { %v763_v19 = vld [vmem:[%s1498_s2] ss:$0 sm:$0xff]  ;;  %v955_v27 = vld [vmem:[#allocation8 + $0x30] sm:$0xff]   ;;  %v956_v28 = vld [vmem:[#allocation8 + $0x38] sm:$0xff]   ;;  %p1073_p3 = pnand %p1072_p10, %p1350_p5  ;;  %s1077_s9 = scalar_lea.vmem %s1076_s30, 256 }
  0x8c   : > { %813 = vmatpush3.bf16.msra.mxu0 %v940_v2  ;;  %821 = vmatpush3.bf16.msra.mxu1 %v942_v6  ;;  %v767_v29 = vld [vmem:[%s1500_s4] ss:$0 sm:$0xff]  ;;  %p1078_p12 = scmp.lt.s32.totalorder %s1454_s15, %s1076_s30  ;;  %p1079_p1 = scmp.lt.s32.totalorder %s1077_s9, %s1071_s16 }
  0x8d   : > { %838 = vmatprep.subr.bf16.mxu0 %v1153_v0  ;;  %822 = vmatprep.subr.bf16.mxu1 %v1153_v0  ;;  %v776_v37 = vld [vmem:[%s1502_s6] ss:$0 sm:$0xff]  ;;  %p1074_p7 = pneg %p1073_p3 }
  0x8e   : > { %p1080_p2 = por %p1079_p1, %p1078_p12 }
  0x8f   : > { %815 = vmatmul.mubr.msk.bf16.vlgmr.msra.gmra.mrb[0].mxu0 %vm364_vm1, %v340_v5 }
  0x90   : > { %854 = vmatprep.mubr.msk.bf16.mxu0 %vm1154_vm0, %v1153_v0  ;;  %823 = vmatpush3.bf16.msra.mxu1 %v943_v7  ;;  %p1081_p4 = pnand %p1080_p2, %p1074_p7 }
  0x91   : > { %824 = vmatprep.subr.bf16.mxu1 %v1153_v0  ;;  %839 = vmatpush3.bf16.msra.mxu0 %v949_v13 }
  0x92   : > { %840 = vmatprep.subr.bf16.mxu0 %v1153_v0 }
  0x94   : > { %825 = vmatpush3.bf16.msra.mxu1 %v944_v8 }
  0x95   : > { %826 = vmatprep.subr.bf16.mxu1 %v1153_v0  ;;  %841 = vmatpush3.bf16.msra.mxu0 %v950_v14 }
  0x96   : > { %842 = vmatprep.subr.bf16.mxu0 %v1153_v0 }
  0x98   : > { %827 = vmatpush3.bf16.msra.mxu1 %v945_v9 }
  0x99   : > { %828 = vmatprep.subr.bf16.mxu1 %v1153_v0  ;;  %843 = vmatpush3.bf16.msra.mxu0 %v951_v15 }
  0x9a   : > { %844 = vmatprep.subr.bf16.mxu0 %v1153_v0 }
  0x9c   : > { %829 = vmatpush3.bf16.msra.mxu1 %v946_v10 }
  0x9d   : > { %830 = vmatprep.subr.bf16.mxu1 %v1153_v0  ;;  %845 = vmatpush3.bf16.msra.mxu0 %v952_v16 }
  0x9e   : > { %846 = vmatprep.subr.bf16.mxu0 %v1153_v0 }
  0xa0   : > { %831 = vmatpush3.bf16.msra.mxu1 %v947_v11 }
  0xa1   : > { %832 = vmatprep.subr.bf16.mxu1 %v1153_v0  ;;  %847 = vmatpush3.bf16.msra.mxu0 %v953_v17 }
  0xa2   : > { %848 = vmatprep.subr.bf16.mxu0 %v1153_v0 }
  0xa4   : > { %833 = vmatpush3.bf16.msra.mxu1 %v948_v12 }
  0xa5   : > { %849 = vmatpush3.bf16.msra.mxu0 %v954_v18 }
  0xa6   : > { %850 = vmatprep.subr.bf16.mxu0 %v1153_v0 }
  0xa9   : > { %851 = vmatpush3.bf16.msra.mxu0 %v955_v27 }
  0xaa   : > { %852 = vmatprep.subr.bf16.mxu0 %v1153_v0 }
  0xad   : > { %853 = vmatpush3.bf16.msra.mxu0 %v956_v28 }
 0x162   : > { %v402_v20 = vpop.f32.mrb[0].mxu0 }
 0x163   : > { %v403_v21 = vadd.f32 %v763_v19, %v402_v20  ;;  %v816_v22 = vpop.f32.mrb[1].mxu0 }
 0x164   : > { %v405_v23 = vpop.f32.mrb[2].mxu0 }
 0x165   : > { %v408_v24 = vmax.f32 %v403_v21, 0.0  ;;  %v817_v25 = vpop.f32.mrb[3].mxu0 }
 0x167   : > { %v409_v26 = vpack.c.bf16 %v408_v24, %v408_v24 }
 0x169   : > { %835 = vmatmul.mubr.bf16.vlgmr.msra.gmra.mrb[0].mxu1 %v409_v26 }
 0x23c   : > { %v515_v30 = vpop.f32.mrb[0].mxu1 }
 0x23d   : > { %v516_v31 = vadd.f32 %v767_v29, %v515_v30  ;;  %v836_v32 = vpop.f32.mrb[1].mxu1 }
 0x23e   : > { %v518_v33 = vpop.f32.mrb[2].mxu1 }
 0x23f   : > { %v521_v34 = vmax.f32 %v516_v31, 0.0  ;;  %v837_v35 = vpop.f32.mrb[3].mxu1 }
 0x241   : > { %v522_v36 = vpack.c.bf16 %v521_v34, %v521_v34 }
 0x243   : > { %855 = vmatmul.mubr.bf16.vlgmr.msra.gmra.mrb[4].mxu0 %v522_v36 }
 0x316   : > { %v628_v38 = vpop.f32.mrb[4].mxu0 }
 0x317   : > { %v629_v39 = vadd.f32 %v776_v37, %v628_v38  ;;  %v856_v40 = vpop.f32.mrb[5].mxu0 }
 0x318   : > { %v631_v41 = vpop.f32.mrb[6].mxu0 }
 0x319   : > { %v634_v42 = vmax.f32 %v629_v39, 0.0  ;;  %v857_v43 = vpop.f32.mrb[7].mxu0 }
 0x31b   : > { %635 = vst [vmem:[%s337_s20] sm:$0xff] %v634_v42 }
 0x31c   : > { %1084 = shalt.err (!%p1081_p4)
}
 0x31d   : > { %s1085_s8 = scalar_lea.hbm %s1452_s21, 128  ;;  %s1089_s11 = scalar_lea.hbm %s1503_s7, 256 }
 0x31e   : > { %p1086_p0 = scmp.ne.s32.totalorder %s1452_s21, %s1085_s8  ;;  %p1090_p8 = scmp.lt.u32.totalorder %s1452_s21, %s1503_s7 }
 0x31f   : > { %p1091_p13 = scmp.lt.u32.totalorder %s1089_s11, %s1085_s8  ;;  %p1093_p10 = scmp.lt.u32.totalorder %s1085_s8, %s1452_s21 }
 0x320   : > { %p1087_p9 = pnand %p1086_p0, %p1350_p5 }
 0x321   : > { %p1092_p6 = por %p1091_p13, %p1090_p8 }
 0x322   : > { %p1088_p11 = pneg %p1087_p9 }
 0x323   : > { %p1094_p3 = por %p1093_p10, %p1092_p6 }
 0x325   : > { %p1095_p7 = pnand %p1094_p3, %p1088_p11 }
 0x327   : > { %1098 = shalt.err (!%p1095_p7)
}
 0x328   : > { %872 = dma.vmem_to_hbm [thread:$0]  (%p1350_p5), %s1454_s15, 128, %s1452_s21, %s637_s28  }
 0x329 PF: > { %s1523_s20 = sld [smem:[#allocation15_spill]]  ;;  %s662_s29 = sand.u32 1, %s1133_s24  }
 0x32a   : > { %p1525_p1 = scmp.ge.s32.totalorder %s1145_s27, 2  ;;  %s663_s12 = scalar_lea.sflag [#allocation4], %s662_s29 }
 0x32f   : > { %p1524_p12 = scmp.ne.s32.totalorder %s1523_s20, 0 }
 0x331   : > { %p889_p2 = pnand %p1525_p1, %p1524_p12 }
 0x333   : > { %1128 = dma.done.wait (!%p889_p2), %s663_s12, 128  }
 0x334   : > { %1130 = vsyncadd (!%p889_p2), %s663_s12, 4294967168  ;;  %p22_p4 = scmp.ge.s32.totalorder %s1336_s22, 4   ;;  %s1526_s24 = smov %s1137_s25 }
 0x335   : > { %s1527_s25 = smov %s1141_s26  ;;  %s1528_s26 = smov %s1346_s18 }
 0x336   : > { %s1529_s27 = smov %s1336_s22  ;;  %24 = sbr.rel (!%p22_p4) target bundleno = 7 (0x7), region = 105 }
 0x33d   :  { %668 = vsyncpa [#allocation3], 1 }
 0x33e   :  { %670 = vsyncpa [#allocation3 + $0x1], 1 }
 0x33f   :  { %671 = vsyncpa [#allocation6], 1 }
 0x340   :  { %672 = vsyncpa [#allocation9], 1 }
 0x341   :  { %673 = vsyncpa [#allocation4], 1 }
 0x342   :  { %675 = vsyncpa [#allocation4 + $0x1], 1 }

</bundles_post_ra>
